<compile_context>
chip_gen: v6e
topology: v6e:2x2x1
jax: 0.10.0
libtpu: 0.0.40
codegen_flags: <defaults>
</compile_context>

<pallas_src>
import functools

import jax
import jax.numpy as jnp
from jax.experimental import pallas as pl
from jax.experimental.pallas import tpu as pltpu


def linear_xent_kernel(xT_ref, w_ref, b_ref, y_ref, loss_ref, acc_ref, *, inv_n):
    """One batch tile: logits = W @ x_tile + b ; acc += sum(xent per column).

    xT_ref  : (F, TB)  f32   input tile, batch on the lane axis
    w_ref   : (C, F)   f32   resident across the grid
    b_ref   : (C, 1)   f32   resident across the grid
    y_ref   : (1, TB)  int32 labels (-1 marks padding)
    loss_ref: (1, 1)   f32   SMEM output (written once, at the last step)
    acc_ref : (1,)     f32   SMEM running sum of per-example losses
    """
    step = pl.program_id(0)

    @pl.when(step == 0)
    def _():
        acc_ref[0] = jnp.float32(0.0)

    # (C, TB) logits; lhs (C,F) x rhs (F,TB) -> no in-kernel operand transpose.
    logits = jax.lax.dot_general(
        w_ref[...], xT_ref[...],
        dimension_numbers=(((1,), (0,)), ((), ())),
        preferred_element_type=jnp.float32,
    ) + b_ref[...]                                                  # bias bcast over lanes

    # Numerically-stable softmax cross-entropy; all reductions run over the
    # C=10 sublane direction, lanes stay dense with batch columns.
    m = jnp.max(logits, axis=0, keepdims=True)                      # (1, TB)
    shifted = logits - m                                            # (C, TB)
    lse = jnp.log(jnp.sum(jnp.exp(shifted), axis=0, keepdims=True)) # (1, TB)

    y = y_ref[...]                                                  # (1, TB)
    row = jax.lax.broadcasted_iota(jnp.int32, logits.shape, 0)      # (C, TB)
    picked = jnp.sum(jnp.where(row == y, shifted, 0.0),
                     axis=0, keepdims=True)                         # (1, TB)

    # Mask padded columns (label -1).
    # TODO(synk): torch cross-entropy raises on out-of-range labels; here any
    # label outside [0, C) other than the -1 padding sentinel silently yields
    # picked = 0 (loss becomes just lse for that row).
    per_example = jnp.where(y >= 0, lse - picked, 0.0)              # (1, TB)
    acc_ref[0] += jnp.sum(per_example)

    @pl.when(step == pl.num_programs(0) - 1)
    def _():
        loss_ref[0, 0] = acc_ref[0] * inv_n


def _batch_tiling(batch):
    """Lane-axis tile: full B for small batches, 512-wide tiles when streaming."""
    if batch <= 512:
        return batch, batch            # single full-extent block, grid of 1
    tb = 512
    padded = ((batch + tb - 1) // tb) * tb
    return tb, padded


@jax.jit
def dumy_model_forward(x, y, weight, bias):
    """Pallas equivalent of DumyModel.forward.

    x: (B, 10) float, y: (B,) or (B, 1) int, weight: (10, 10) torch [out, in]
    layout, bias: (10,).  Returns (output_dict, loss_scalar, metrics_dict).
    """
    B, F = x.shape
    C = weight.shape[0]
    TB, B_pad = _batch_tiling(B)

    x_t = x.astype(jnp.float32).T                  # (F, B): batch on lanes
    y2 = y.reshape(1, -1).astype(jnp.int32)        # y.view(-1) -> (1, B)
    if B_pad != B:
        x_t = jnp.pad(x_t, ((0, 0), (0, B_pad - B)))
        y2 = jnp.pad(y2, ((0, 0), (0, B_pad - B)), constant_values=-1)
    w = weight.astype(jnp.float32)                 # (C, F), torch layout
    b2 = bias.reshape(-1, 1).astype(jnp.float32)   # (C, 1)

    kernel = functools.partial(linear_xent_kernel, inv_n=1.0 / B)

    loss = pl.pallas_call(
        kernel,
        out_shape=jax.ShapeDtypeStruct((1, 1), jnp.float32),
        grid=(B_pad // TB,),
        in_specs=[
            pl.BlockSpec((F, TB), lambda i: (0, i)),   # x tile, streamed
            pl.BlockSpec((C, F), lambda i: (0, 0)),    # weight, resident
            pl.BlockSpec((C, 1), lambda i: (0, 0)),    # bias, resident
            pl.BlockSpec((1, TB), lambda i: (0, i)),   # labels tile, streamed
        ],
        out_specs=pl.BlockSpec((1, 1), lambda i: (0, 0),
                               memory_space=pltpu.SMEM),
        scratch_shapes=[pltpu.SMEM((1,), jnp.float32)],
        compiler_params=pltpu.CompilerParams(
            # Scalar-accumulator carry across the batch axis -> "arbitrary".
            # TODO(synk): to use both v7x TensorCores, emit per-core partial
            # sums (lane-dense output) and reduce them in the wrapper.
            dimension_semantics=("arbitrary",)),
    )(x_t, w, b2, y2)

    output = {}
    metrics = {}
    return output, loss[0, 0], metrics


def _reference_loss(x, y, weight, bias):
    """Pure-jnp reference of Linear + softmax cross-entropy (mean)."""
    logits = x.astype(jnp.float32) @ weight.astype(jnp.float32).T + bias
    y = y.reshape(-1).astype(jnp.int32)
    shifted = logits - jnp.max(logits, axis=-1, keepdims=True)
    lse = jnp.log(jnp.sum(jnp.exp(shifted), axis=-1))
    picked = jnp.take_along_axis(shifted, y[:, None], axis=-1)[:, 0]
    return jnp.mean(lse - picked)


if __name__ == "__main__":
    key = jax.random.PRNGKey(0)
    kx, ky, kw, kb = jax.random.split(key, 4)

    F = C = 10
    B = 8
    x = jax.random.normal(kx, (B, F), dtype=jnp.float32)
    y = jax.random.randint(ky, (B,), 0, C, dtype=jnp.int32)

    # torch.nn.Linear-style init: U(-1/sqrt(in), 1/sqrt(in)).
    bound = 1.0 / (F ** 0.5)
    weight = jax.random.uniform(kw, (C, F), minval=-bound, maxval=bound,
                                dtype=jnp.float32)
    bias = jax.random.uniform(kb, (C,), minval=-bound, maxval=bound,
                              dtype=jnp.float32)

    output, loss, metrics = dumy_model_forward(x, y, weight, bias)
    jax.block_until_ready(loss)
    ref = _reference_loss(x, y, weight, bias)
    assert jnp.allclose(loss, ref, rtol=1e-5, atol=1e-5), (loss, ref)

    # Exercise the streaming path: multi-step grid + zero-padded last tile.
    B2 = 1000
    kx2, ky2 = jax.random.split(kx)
    x2 = jax.random.normal(kx2, (B2, F), dtype=jnp.float32)
    y2 = jax.random.randint(ky2, (B2,), 0, C, dtype=jnp.int32)
    _, loss2, _ = dumy_model_forward(x2, y2, weight, bias)
    jax.block_until_ready(loss2)
    ref2 = _reference_loss(x2, y2, weight, bias)
    assert jnp.allclose(loss2, ref2, rtol=1e-5, atol=1e-5), (loss2, ref2)

    print("KERNEL_OK")
</pallas_src>

<mosaic_0001>
module attributes {stable_mosaic.version = 11 : i64} {
  func.func @linear_xent_kernel(%arg0: i32, %arg1: memref<10x8xf32, #tpu.memory_space<vmem>>, %arg2: memref<10x10xf32, #tpu.memory_space<vmem>>, %arg3: memref<10x1xf32, #tpu.memory_space<vmem>>, %arg4: memref<1x8xi32, #tpu.memory_space<vmem>>, %arg5: memref<1x1xf32, #tpu.memory_space<smem>>, %arg6: memref<1xf32, #tpu.memory_space<smem>>) attributes {dimension_semantics = [#tpu.dimension_semantics<arbitrary>], iteration_bounds = array<i64: 1>, scalar_prefetch = 0 : i64, scratch_operands = 1 : i64, tpu.core_type = #tpu.core_type<tc>, window_params = [{transform_indices = @transform_0, window_bounds = array<i64: 10, 8>}, {pipeline_mode = #tpu.pipeline_mode<synchronous>, transform_indices = @transform_1, window_bounds = array<i64: 10, 10>}, {pipeline_mode = #tpu.pipeline_mode<synchronous>, transform_indices = @transform_2, window_bounds = array<i64: 10, 1>}, {transform_indices = @transform_3, window_bounds = array<i64: 1, 8>}, {transform_indices = @transform_4, window_bounds = array<i64: 1, 1>}]} {
    %c0_i32 = arith.constant 0 : i32
    %0 = arith.cmpi eq, %arg0, %c0_i32 : i32
    %1 = arith.extui %0 : i1 to i32
    %c0_i32_0 = arith.constant 0 : i32
    %2 = arith.cmpi ne, %1, %c0_i32_0 : i32
    scf.if %2 {
      %cst_19 = arith.constant 0.000000e+00 : f32
      %c0_20 = arith.constant 0 : index
      %40 = memref.load %arg6[%c0_20] : memref<1xf32, #tpu.memory_space<smem>>
      memref.store %cst_19, %arg6[%c0_20] : memref<1xf32, #tpu.memory_space<smem>>
    } else {
    }
    %c0 = arith.constant 0 : index
    %c0_1 = arith.constant 0 : index
    %3 = vector.load %arg2[%c0, %c0_1] : memref<10x10xf32, #tpu.memory_space<vmem>>, vector<10x10xf32>
    %c0_2 = arith.constant 0 : index
    %c0_3 = arith.constant 0 : index
    %4 = vector.load %arg1[%c0_2, %c0_3] : memref<10x8xf32, #tpu.memory_space<vmem>>, vector<10x8xf32>
    %cst = arith.constant dense<0.000000e+00> : vector<10x8xf32>
    %5 = tpu.matmul %3, %4, %cst {dimension_numbers = #tpu.dot_dimension_numbers<[1], [0], [0], [1], [0, 0, 1, 1], [], []>} : vector<10x10xf32>, vector<10x8xf32>, vector<10x8xf32> -> vector<10x8xf32>
    %c0_4 = arith.constant 0 : index
    %c0_5 = arith.constant 0 : index
    %6 = vector.load %arg3[%c0_4, %c0_5] : memref<10x1xf32, #tpu.memory_space<vmem>>, vector<10x1xf32>
    %7 = vector.broadcast %6 : vector<10x1xf32> to vector<10x8xf32>
    %8 = arith.addf %5, %7 : vector<10x8xf32>
    %cst_6 = arith.constant dense<0xFF800000> : vector<8xf32>
    %9 = vector.multi_reduction <maximumf>, %8, %cst_6 [0] : vector<10x8xf32> to vector<8xf32>
    %10 = vector.shape_cast %9 : vector<8xf32> to vector<1x8xf32>
    %11 = vector.broadcast %10 : vector<1x8xf32> to vector<10x8xf32>
    %12 = arith.subf %8, %11 : vector<10x8xf32>
    %13 = math.exp %12 : vector<10x8xf32>
    %cst_7 = arith.constant dense<0.000000e+00> : vector<8xf32>
    %14 = vector.multi_reduction <add>, %13, %cst_7 [0] : vector<10x8xf32> to vector<8xf32>
    %15 = vector.shape_cast %14 : vector<8xf32> to vector<1x8xf32>
    %16 = math.log %15 : vector<1x8xf32>
    %c0_8 = arith.constant 0 : index
    %c0_9 = arith.constant 0 : index
    %17 = vector.load %arg4[%c0_8, %c0_9] : memref<1x8xi32, #tpu.memory_space<vmem>>, vector<1x8xi32>
    %18 = tpu.iota {dimensions = array<i32: 0>} : vector<10x8xi32>
    %19 = vector.broadcast %17 : vector<1x8xi32> to vector<10x8xi32>
    %20 = arith.cmpi eq, %18, %19 : vector<10x8xi32>
    %cst_10 = arith.constant 0.000000e+00 : f32
    %21 = vector.broadcast %cst_10 : f32 to vector<10x8xf32>
    %22 = arith.select %20, %12, %21 : vector<10x8xi1>, vector<10x8xf32>
    %cst_11 = arith.constant dense<0.000000e+00> : vector<8xf32>
    %23 = vector.multi_reduction <add>, %22, %cst_11 [0] : vector<10x8xf32> to vector<8xf32>
    %24 = vector.shape_cast %23 : vector<8xf32> to vector<1x8xf32>
    %c0_i32_12 = arith.constant 0 : i32
    %25 = vector.broadcast %c0_i32_12 : i32 to vector<1x8xi32>
    %26 = arith.cmpi sge, %17, %25 : vector<1x8xi32>
    %27 = arith.subf %16, %24 : vector<1x8xf32>
    %cst_13 = arith.constant 0.000000e+00 : f32
    %28 = vector.broadcast %cst_13 : f32 to vector<1x8xf32>
    %29 = arith.select %26, %27, %28 : vector<1x8xi1>, vector<1x8xf32>
    %c0_14 = arith.constant 0 : index
    %30 = memref.load %arg6[%c0_14] : memref<1xf32, #tpu.memory_space<smem>>
    %31 = vector.shape_cast %29 : vector<1x8xf32> to vector<1x1x8xf32>
    %cst_15 = arith.constant dense<0.000000e+00> : vector<1xf32>
    %32 = vector.multi_reduction <add>, %31, %cst_15 [1, 2] : vector<1x1x8xf32> to vector<1xf32>
    %33 = vector.shape_cast %32 : vector<1xf32> to vector<1x1x1xf32>
    %34 = vector.extract %33[0, 0, 0] : f32 from vector<1x1x1xf32>
    %35 = arith.addf %30, %34 : f32
    %c0_16 = arith.constant 0 : index
    %36 = memref.load %arg6[%c0_16] : memref<1xf32, #tpu.memory_space<smem>>
    memref.store %35, %arg6[%c0_16] : memref<1xf32, #tpu.memory_space<smem>>
    %c0_i32_17 = arith.constant 0 : i32
    %37 = arith.cmpi eq, %arg0, %c0_i32_17 : i32
    %38 = arith.extui %37 : i1 to i32
    %c0_i32_18 = arith.constant 0 : i32
    %39 = arith.cmpi ne, %38, %c0_i32_18 : i32
    scf.if %39 {
      %c0_19 = arith.constant 0 : index
      %40 = memref.load %arg6[%c0_19] : memref<1xf32, #tpu.memory_space<smem>>
      %cst_20 = arith.constant 1.250000e-01 : f32
      %41 = arith.mulf %40, %cst_20 : f32
      %c0_21 = arith.constant 0 : index
      %c0_22 = arith.constant 0 : index
      %42 = memref.load %arg5[%c0_21, %c0_22] : memref<1x1xf32, #tpu.memory_space<smem>>
      memref.store %41, %arg5[%c0_21, %c0_22] : memref<1x1xf32, #tpu.memory_space<smem>>
    } else {
    }
    return
  }
  func.func @transform_0(%arg0: i32) -> (i32, i32) {
    %c0_i32 = arith.constant 0 : i32
    %c0_i32_0 = arith.constant 0 : i32
    return %c0_i32, %arg0 : i32, i32
  }
  func.func @transform_1(%arg0: i32) -> (i32, i32) {
    %c0_i32 = arith.constant 0 : i32
    %c0_i32_0 = arith.constant 0 : i32
    %c0_i32_1 = arith.constant 0 : i32
    return %c0_i32, %c0_i32_0 : i32, i32
  }
  func.func @transform_2(%arg0: i32) -> (i32, i32) {
    %c0_i32 = arith.constant 0 : i32
    %c0_i32_0 = arith.constant 0 : i32
    %c0_i32_1 = arith.constant 0 : i32
    return %c0_i32, %c0_i32_0 : i32, i32
  }
  func.func @transform_3(%arg0: i32) -> (i32, i32) {
    %c0_i32 = arith.constant 0 : i32
    %c0_i32_0 = arith.constant 0 : i32
    return %c0_i32, %arg0 : i32, i32
  }
  func.func @transform_4(%arg0: i32) -> (i32, i32) {
    %c0_i32 = arith.constant 0 : i32
    %c0_i32_0 = arith.constant 0 : i32
    %c0_i32_1 = arith.constant 0 : i32
    return %c0_i32, %c0_i32_0 : i32, i32
  }
}

</mosaic_0001>

<bundles_post_ra>
// kernel: dumy_model_forward.1
= control target key start
LH: loop header
LB: loop body
LE: loop exit
PB: predicated region body
PF: predicated region fallthrough
CT: control target
= control target key end

     0   :  { %vm47_vm0 = vcmask 1041408   ;;  %vm40_vm1 = vcmask 80896   ;;  %v248_v5 = vmov 0   ;;  %s305_s0 = inlined_call_operand.vmem [shape: f32[10,8], index: 0, kind: input, shape index: {}]   ;;  %s306_s1 = inlined_call_operand.vmem [shape: f32[10,10], index: 1, kind: input, shape index: {}]   ;;  %s307_s2 = inlined_call_operand.vmem [shape: f32[10,1], index: 2, kind: input, shape index: {}]   ;;  %s308_s3 = inlined_call_operand.vmem [shape: s32[1,8], index: 3, kind: input, shape index: {}]   ;;  %s309_s4 = inlined_call_operand.hbm [shape: f32[1,1], index: 4, kind: output, shape index: {}]  }
   0x1   :  { %v27_v0 = vld [vmem:[%s305_s0 + $0x8] sm:$0x3]  ;;  %v26_v1 = vld [vmem:[%s305_s0] sm:$0xff]  ;;  %231 = vset.pattern.permute.xlu0 %v248_v5 }
   0x2   :  { %v24_v2 = vld [vmem:[%s306_s1] sm:$0xff]  ;;  %220 = vmatprep.subr.msk.mxu0 %vm47_vm0, %v27_v0  ;;  %v25_v4 = vld [vmem:[%s306_s1 + $0x8] sm:$0x3] }
   0x3   :  { %224 = vmatprep.mubr.msk.f32.mxu0 %vm40_vm1, %v24_v2  ;;  %v28_v3 = vld [vmem:[%s307_s2] sm:$0xff]  ;;  %221 = vmatpush3.msk.msra.mxu0 %vm47_vm0, %v27_v0 }
   0x4   :  { %9 = vsyncpa [#allocation4], 0  ;;  %222 = vmatprep.subr.mxu0 %v26_v1  ;;  %32 = vperm.xlu0 %231, %v28_v3   ;;  %v29_v6 = vld [vmem:[%s307_s2 + $0x8] sm:$0x3]  ;;  %vm128_vm2 = vcmask 58368   ;;  %vm126_vm3 = vcmask 64512   ;;  %v155_v22 = vlaneseq }
   0x5   :  { %223 = vmatpush3.msra.mxu0 %v26_v1  ;;  %v154_v29 = vld [vmem:[%s308_s3] sm:$0x1]  ;;  %vm179_vm7 = vcmask 57344   ;;  %s249_s27 = smov [#allocation3]  }
   0x6   :  { %225 = vmatmul.mubr.msk.f32.vlgmr.msra.gmra.mxu0 %vm40_vm1, %v25_v4  ;;  %v156_v27 = vshrl.u32 %v155_v22, 7  ;;  %vm175_vm6 = vcmp.ge.s32.totalorder %v154_v29, 0 }
   0x8   :  { %37 = vperm.xlu0 %231, %v29_v6   ;;  %v160_v28 = vsub.s32 0, %v156_v27  ;;  %v157_v30 = vadd.s32 8, %v156_v27 }
   0xa   :  { %v161_v31 = vrot.slane %v154_v29, %v160_v28 }
   0xc   :  { %vm162_vm4 = vcmp.eq.s32.totalorder %v156_v27, %v161_v31  ;;  %vm163_vm5 = vcmp.eq.s32.totalorder %v157_v30, %v161_v31 }
  0x7f   :  { %v33_v7 = vpop.permute.xlu0 %32 }
  0x83   :  { %v38_v8 = vpop.permute.xlu0 %37 }
  0xc6   :  { %v226_v9 = vpop.f32.mrf.mxu0 }
  0xc7   :  { %v123_v10 = vadd.f32 %v226_v9, %v38_v8 }
  0xc8   :  { %v117_v11 = vpop.f32.mrf.mxu0 }
  0xc9   :  { %v118_v12 = vadd.f32 %v117_v11, %v33_v7  ;;  %v129_v13 = vsel %vm128_vm2, %v123_v10, -inf }
  0xcb   :  { %v127_v14 = vsel %vm126_vm3, %v118_v12, -inf }
  0xcc   :  { %v130_v15 = vmax.f32 %v127_v14, %v129_v13 }
  0xce   :  { %v131_v16 = vrot.slane %v130_v15, 4 }
  0xd0   :  { %v132_v17 = vmax.f32 %v130_v15, %v131_v16 }
  0xd2   :  { %v133_v18 = vrot.slane %v132_v17, 2 }
  0xd4   :  { %v134_v19 = vmax.f32 %v132_v17, %v133_v18 }
  0xd6   :  { %v135_v20 = vrot.slane %v134_v19, 1 }
  0xd8   :  { %v136_v21 = vmax.f32 %v134_v19, %v135_v20 }
  0xda   :  { %v137_v23 = vsub.f32 %v118_v12, %v136_v21  ;;  %v138_v24 = vsub.f32 %v123_v10, %v136_v21 }
  0xdc   :  { %v139_v25 = vmul.f32 1.442695, %v137_v23  ;;  %v141_v26 = vmul.f32 1.442695, %v138_v24  ;;  %v164_v35 = vsel %vm162_vm4, %v137_v23, 0.0  ;;  %v165_v36 = vsel %vm163_vm5, %v138_v24, 0.0 }
  0xdd   :  { %v166_v39 = vsel %vm126_vm3, %v164_v35, 0.0  ;;  %v167_v40 = vsel %vm128_vm2, %v165_v36, 0.0 }
  0xde   :  { %232 = vpow2.f32 %v139_v25  ;;  %v168_v43 = vadd.f32 %v167_v40, %v166_v39 }
  0xdf   :  { %234 = vpow2.f32 %v141_v26 }
  0xe0   :  { %v169_v46 = vrot.slane %v168_v43, 4 }
  0xe2   :  { %v170_v49 = vadd.f32 %v169_v46, %v168_v43 }
  0xe4   :  { %v171_v50 = vrot.slane %v170_v49, 2 }
  0xe6   :  { %v172_v51 = vadd.f32 %v171_v50, %v170_v49 }
  0xe8   :  { %v173_v52 = vrot.slane %v172_v51, 1 }
  0xea   :  { %v174_v55 = vadd.f32 %v173_v52, %v172_v51 }
  0xeb   :  { %v233_v32 = vpop.eup %232 }
  0xec   :  { %v235_v33 = vpop.eup %234  ;;  %v143_v34 = vsel %vm126_vm3, %v233_v32, 0.0 }
  0xed   :  { %v144_v37 = vsel %vm128_vm2, %v235_v33, 0.0 }
  0xee   :  { %v145_v38 = vadd.f32 %v144_v37, %v143_v34 }
  0xf0   :  { %v146_v41 = vrot.slane %v145_v38, 4 }
  0xf2   :  { %v147_v42 = vadd.f32 %v146_v41, %v145_v38 }
  0xf4   :  { %v148_v44 = vrot.slane %v147_v42, 2 }
  0xf6   :  { %v149_v45 = vadd.f32 %v148_v44, %v147_v42 }
  0xf8   :  { %v150_v47 = vrot.slane %v149_v45, 1 }
  0xfa   :  { %v151_v48 = vadd.f32 %v150_v47, %v149_v45 }
  0xfc   :  { %236 = vlog2.f32 %v151_v48 }
 0x109   :  { %v237_v53 = vpop.eup %236 }
 0x10a   :  { %v153_v54 = vmul.f32 0.6931472, %v237_v53 }
 0x10c   :  { %v176_v56 = vsub.f32 %v153_v54, %v174_v55 }
 0x10e   :  { %v177_v57 = vsel %vm175_vm6, %v176_v56, 0.0 }
 0x10f   :  { %v180_v58 = vsel %vm179_vm7, %v177_v57, 0.0 }
 0x110   :  { %181 = vadd.xlane.f32.xlu1 %v180_v58 }
 0x199   :  { %v182_v59 = vpop.xlane.xlu1 %181 }
 0x19a   :  { %v183_v60 = vrot.slane %v182_v59, 4 }
 0x19c   :  { %v184_v61 = vadd.f32 %v183_v60, %v182_v59 }
 0x19e   :  { %v185_v62 = vrot.slane %v184_v61, 2 }
 0x1a0   :  { %v186_v63 = vadd.f32 %v185_v62, %v184_v61 }
 0x1a2   :  { %v187_v0 = vrot.slane %v186_v63, 1 }
 0x1a4   :  { %v188_v1 = vadd.f32 %v187_v0, %v186_v63 }
 0x1a6   :  { %227 = vpush %v188_v1 }
 0x1d7   :  { %s228_s3 = spop %227 }
 0x1d8   :  { %s197_s26 = smul.f32 0.125, %s228_s3 }
 0x1da   :  { %199 = sst [smem:[#allocation3]] %s197_s26 }
 0x1db   :  { %207 = dma.smem_to_hbm %s249_s27, 16, %s309_s4, [#allocation4]  }
 0x1dc   :  { %246 = dma.done.wait [#allocation4], 16  }
 0x1dd   :  { %247 = vsyncadd [#allocation4], 4294967280 }
 0x1de   :  { %211 = sfence }
 0x1df   :  { %212 = vsyncpa [#allocation4], 1 }

</bundles_post_ra>
